<compile_context>
chip_gen: v7x
topology: tpu7x:2x2x1
jax: 0.10.0
libtpu: 0.0.40
codegen_flags: <defaults>
</compile_context>

<pallas_src>
import functools

import jax
import jax.numpy as jnp
from jax.experimental import pallas as pl
from jax.experimental.pallas import tpu as pltpu


def attention_kernel(enc_ref, hb_ref, wet_ref, v_ref, out_ref, *,
                     s_real, approx_recip):
    # enc_ref: (Bt, S_pad, D)  encoder outputs tile (compute dtype, bf16 default)
    # hb_ref:  (Bt, 1, H)      hidden[-1] @ Wh^T + bias, precomputed in f32
    # wet_ref: (D, H)          We^T (compute dtype), pre-transposed in wrapper
    # v_ref:   (1, 1, H)       attention vector v (f32)
    # out_ref: (Bt, 1, S_pad)  softmaxed attention weights (f32), lane-dense in S
    Bt, S_pad, D = enc_ref.shape
    H = wet_ref.shape[1]

    # (1) Main projection on the MXU, f32 accumulation.  S_pad % 128 == 0, so
    #     the leading-dim collapse / expand reshapes are free relayouts.
    enc2 = enc_ref[...].reshape(Bt * S_pad, D)
    proj = jnp.dot(enc2, wet_ref[...],
                   preferred_element_type=jnp.float32)            # (Bt*S_pad, H) f32
    energy = jnp.tanh(proj.reshape(Bt, S_pad, H) + hb_ref[...])   # (Bt, S_pad, H) f32 (EUP)

    # (2) v-dot on the MXU: batched M=1 matmul, contraction over H.
    vb = jnp.broadcast_to(v_ref[...], (Bt, 1, H))
    scores = jnp.einsum('bqh,bsh->bqs', vb, energy,
                        preferred_element_type=jnp.float32)       # (Bt, 1, S_pad) f32

    # (3) Mask padded columns (static check) and softmax over the lane dim.
    if s_real != S_pad:
        col = jax.lax.broadcasted_iota(jnp.int32, (Bt, 1, S_pad), 2)
        scores = jnp.where(col < s_real, scores, jnp.float32(-1e30))

    m = jnp.max(scores, axis=-1, keepdims=True)
    e = jnp.exp(scores - m)                                       # EUP exp
    denom = jnp.sum(e, axis=-1, keepdims=True)
    out_ref[...] = (e * pl.reciprocal(denom, approx=approx_recip)
                    ).astype(out_ref.dtype)


def _tpu_hints():
    """Returns (vmem_capacity_bytes, tensorcores_per_chip) with safe fallbacks."""
    cap, cores = 128 * 1024 * 1024, 1
    try:
        info = pltpu.get_tpu_info()
        for attr in ("vmem_capacity_bytes", "vmem_size_bytes", "vmem_bytes"):
            val = getattr(info, attr, None)
            if val:
                cap = int(val)
                break
        for attr in ("num_cores", "core_count", "num_tensorcores"):
            val = getattr(info, attr, None)
            if val:
                cores = int(val)
                break
    except Exception:
        pass
    return cap, cores


def _pick_batch_tile(B, S_pad, D, H, comp_bytes, vmem_limit, min_steps):
    """Largest divisor of B whose per-step VMEM footprint fits ~60% of the limit."""
    per_row = (2 * S_pad * D * comp_bytes   # enc block, double-buffered
               + 2 * H * 4                  # hid_bias block, double-buffered
               + 2 * S_pad * 4              # out block, double-buffered
               + 2 * S_pad * H * 4)         # f32 proj/energy intermediates
    resident = 2 * D * H * comp_bytes + 2 * H * 4   # We^T + v
    budget = int(vmem_limit * 0.6) - resident
    cap = max(1, budget // per_row)
    if min_steps > 1:
        # Give every TensorCore at least one grid step to chew on.
        cap = min(cap, max(1, B // min_steps))
    cap = min(cap, B)
    bt = 1
    for d in range(1, B + 1):
        if B % d == 0 and d <= cap:
            bt = d
    return bt


def attention_forward(hidden, encoder_outputs, weight, bias, v, *,
                      compute_dtype=jnp.bfloat16, approx_reciprocal=True):
    """hidden: (L, B, H); encoder_outputs: (B, S, D); weight: (H, H+D);
    bias: (H,); v: (H,).  Returns softmax attention weights (B, S) in f32."""
    L, B, H = hidden.shape
    _, S, D = encoder_outputs.shape

    # --- Glue done once in XLA (wrapper side) ---
    wh = weight[:, :H]                                   # (H, H)
    we_t = weight[:, H:].T.astype(compute_dtype)         # (D, H), pre-transposed
    hid_bias = (hidden[-1].astype(jnp.float32) @ wh.T.astype(jnp.float32)
                + bias.astype(jnp.float32)).reshape(B, 1, H)   # one batched matmul
    v3 = v.astype(jnp.float32).reshape(1, 1, H)

    # Pad S to a lane-dense multiple of 128: free (Bt,S,D)->(Bt*S,D) relayout
    # in the kernel and unmasked lane-dense output stores.
    S_pad = ((S + 127) // 128) * 128
    enc = encoder_outputs.astype(compute_dtype)
    if S_pad != S:
        enc = jnp.pad(enc, ((0, 0), (0, S_pad - S), (0, 0)))

    # Generation-aware VMEM limit and TensorCore-count hint.
    vmem_cap, cores = _tpu_hints()
    vmem_limit = min(96 * 1024 * 1024, (vmem_cap * 3) // 4)   # ~96 MiB (v5e/v6e) / ~48 MiB (v7x)
    min_steps = 2 if (cores >= 2 or vmem_cap <= 64 * 1024 * 1024) else 1
    comp_bytes = jnp.dtype(compute_dtype).itemsize
    Bt = _pick_batch_tile(B, S_pad, D, H, comp_bytes, vmem_limit, min_steps)
    grid = (B // Bt,)

    kernel = functools.partial(attention_kernel, s_real=S,
                               approx_recip=approx_reciprocal)

    out = pl.pallas_call(
        kernel,
        out_shape=jax.ShapeDtypeStruct((B, 1, S_pad), jnp.float32),
        grid_spec=pltpu.PrefetchScalarGridSpec(
            num_scalar_prefetch=0,
            grid=grid,
            in_specs=[
                pl.BlockSpec((Bt, S_pad, D), lambda b: (b, 0, 0)),   # enc tile (streamed)
                pl.BlockSpec((Bt, 1, H), lambda b: (b, 0, 0)),       # hid proj + bias tile
                pl.BlockSpec((D, H), lambda b: (0, 0)),              # We^T (resident)
                pl.BlockSpec((1, 1, H), lambda b: (0, 0, 0)),        # v (resident)
            ],
            out_specs=pl.BlockSpec((Bt, 1, S_pad), lambda b: (b, 0, 0)),
        ),
        compiler_params=pltpu.CompilerParams(
            dimension_semantics=("parallel",),      # batch tiles shard across TCs
            vmem_limit_bytes=int(vmem_limit),
        ),
    )(enc, hid_bias, we_t, v3)
    return out[:, 0, :S]


def attention_reference(hidden, encoder_outputs, weight, bias, v):
    """Pure-JAX reference matching the PyTorch forward exactly (f32)."""
    h = hidden[-1]                                                # (B, H)
    B, S, D = encoder_outputs.shape
    h_rep = jnp.repeat(h[:, None, :], S, axis=1)                  # (B, S, H)
    combined = jnp.concatenate([h_rep, encoder_outputs], axis=2)  # (B, S, H+D)
    energy = jnp.tanh(combined @ weight.T + bias)                 # (B, S, H)
    scores = jnp.einsum('h,bsh->bs', v, energy)                   # (B, S)
    return jax.nn.softmax(scores, axis=1)


def _make_inputs(key, L, B, S, hidden_dim, input_dim):
    k1, k2, k3, k4, k5 = jax.random.split(key, 5)
    hidden = jax.random.normal(k1, (L, B, hidden_dim), dtype=jnp.float32)
    encoder_outputs = jax.random.normal(k2, (B, S, input_dim), dtype=jnp.float32)
    bound = 1.0 / jnp.sqrt(hidden_dim + input_dim)
    weight = jax.random.uniform(k3, (hidden_dim, hidden_dim + input_dim),
                                minval=-bound, maxval=bound, dtype=jnp.float32)
    bias = jax.random.uniform(k4, (hidden_dim,), minval=-bound, maxval=bound,
                              dtype=jnp.float32)
    v = jax.random.uniform(k5, (hidden_dim,), dtype=jnp.float32)  # torch.rand -> U[0,1)
    return hidden, encoder_outputs, weight, bias, v


if __name__ == "__main__":
    key = jax.random.PRNGKey(0)

    # --- Small config matching the module's typical shapes ---
    L, B, S, H, D = 2, 2, 8, 32, 16
    hidden, enc, weight, bias, v = _make_inputs(key, L, B, S, H, D)
    ref = attention_reference(hidden, enc, weight, bias, v)

    # Exact-semantics path (f32 compute, exact reciprocal): tight check.
    out_exact = jax.block_until_ready(
        attention_forward(hidden, enc, weight, bias, v,
                          compute_dtype=jnp.float32, approx_reciprocal=False))
    assert out_exact.shape == (B, S)
    assert jnp.allclose(out_exact, ref, atol=1e-5, rtol=1e-5), "f32 mismatch vs reference"
    assert jnp.allclose(jnp.sum(out_exact, axis=1), 1.0, atol=1e-5)

    # Default fast path (bf16 MXU operands + approx EUP reciprocal): loose check.
    out_fast = jax.block_until_ready(attention_forward(hidden, enc, weight, bias, v))
    assert out_fast.shape == (B, S)
    assert jnp.allclose(out_fast, ref, atol=5e-2), "bf16 mismatch vs reference"
    assert jnp.allclose(jnp.sum(out_fast, axis=1), 1.0, atol=1e-2)

    # --- Larger config exercising batch tiling and S-padding/masking (S=100) ---
    key2 = jax.random.PRNGKey(1)
    L2, B2, S2, H2, D2 = 2, 64, 100, 64, 32
    hidden2, enc2, weight2, bias2, v2 = _make_inputs(key2, L2, B2, S2, H2, D2)
    ref2 = attention_reference(hidden2, enc2, weight2, bias2, v2)

    out2_exact = jax.block_until_ready(
        attention_forward(hidden2, enc2, weight2, bias2, v2,
                          compute_dtype=jnp.float32, approx_reciprocal=False))
    assert out2_exact.shape == (B2, S2)
    assert jnp.allclose(out2_exact, ref2, atol=1e-5, rtol=1e-5), "tiled f32 mismatch"
    assert jnp.allclose(jnp.sum(out2_exact, axis=1), 1.0, atol=1e-5)

    out2_fast = jax.block_until_ready(
        attention_forward(hidden2, enc2, weight2, bias2, v2))
    assert out2_fast.shape == (B2, S2)
    assert jnp.allclose(out2_fast, ref2, atol=5e-2), "tiled bf16 mismatch"
    assert jnp.allclose(jnp.sum(out2_fast, axis=1), 1.0, atol=1e-2)

    print("KERNEL_OK")
</pallas_src>

<mosaic_0001>
module attributes {stable_mosaic.version = 11 : i64} {
  func.func @attention_kernel(%arg0: i32, %arg1: memref<2x128x16xf32, #tpu.memory_space<vmem>>, %arg2: memref<2x1x32xf32, #tpu.memory_space<vmem>>, %arg3: memref<16x32xf32, #tpu.memory_space<vmem>>, %arg4: memref<1x1x32xf32, #tpu.memory_space<vmem>>, %arg5: memref<2x1x128xf32, #tpu.memory_space<vmem>>) attributes {dimension_semantics = [#tpu.dimension_semantics<parallel>], iteration_bounds = array<i64: 1>, scalar_prefetch = 0 : i64, scratch_operands = 0 : i64, tpu.core_type = #tpu.core_type<tc>, window_params = [{transform_indices = @transform_0, window_bounds = array<i64: 2, 128, 16>}, {transform_indices = @transform_1, window_bounds = array<i64: 2, 1, 32>}, {pipeline_mode = #tpu.pipeline_mode<synchronous>, transform_indices = @transform_2, window_bounds = array<i64: 16, 32>}, {pipeline_mode = #tpu.pipeline_mode<synchronous>, transform_indices = @transform_3, window_bounds = array<i64: 1, 1, 32>}, {transform_indices = @transform_4, window_bounds = array<i64: 2, 1, 128>}]} {
    %c0 = arith.constant 0 : index
    %c0_0 = arith.constant 0 : index
    %c0_1 = arith.constant 0 : index
    %0 = vector.load %arg1[%c0, %c0_0, %c0_1] : memref<2x128x16xf32, #tpu.memory_space<vmem>>, vector<2x128x16xf32>
    %1 = vector.shape_cast %0 : vector<2x128x16xf32> to vector<256x16xf32>
    %c0_2 = arith.constant 0 : index
    %c0_3 = arith.constant 0 : index
    %2 = vector.load %arg3[%c0_2, %c0_3] : memref<16x32xf32, #tpu.memory_space<vmem>>, vector<16x32xf32>
    %cst = arith.constant dense<0.000000e+00> : vector<256x32xf32>
    %3 = tpu.matmul %1, %2, %cst {dimension_numbers = #tpu.dot_dimension_numbers<[1], [0], [0], [1], [0, 0, 1, 1], [], []>} : vector<256x16xf32>, vector<16x32xf32>, vector<256x32xf32> -> vector<256x32xf32>
    %4 = vector.shape_cast %3 : vector<256x32xf32> to vector<2x128x32xf32>
    %c0_4 = arith.constant 0 : index
    %c0_5 = arith.constant 0 : index
    %c0_6 = arith.constant 0 : index
    %5 = vector.load %arg2[%c0_4, %c0_5, %c0_6] : memref<2x1x32xf32, #tpu.memory_space<vmem>>, vector<2x1x32xf32>
    %6 = vector.broadcast %5 : vector<2x1x32xf32> to vector<2x128x32xf32>
    %7 = arith.addf %4, %6 : vector<2x128x32xf32>
    %8 = math.tanh %7 : vector<2x128x32xf32>
    %c0_7 = arith.constant 0 : index
    %c0_8 = arith.constant 0 : index
    %c0_9 = arith.constant 0 : index
    %9 = vector.load %arg4[%c0_7, %c0_8, %c0_9] : memref<1x1x32xf32, #tpu.memory_space<vmem>>, vector<1x1x32xf32>
    %10 = vector.shape_cast %9 : vector<1x1x32xf32> to vector<1x1x32xf32>
    %11 = vector.broadcast %10 : vector<1x1x32xf32> to vector<2x1x32xf32>
    "tpu.trace_start"() <{level = 10 : i32, message = "bqh,bsh->bqs"}> : () -> ()
    %cst_10 = arith.constant dense<0.000000e+00> : vector<2x1x128xf32>
    %12 = tpu.matmul %11, %8, %cst_10 {dimension_numbers = #tpu.dot_dimension_numbers<[2], [2], [1], [1], [0, 0, 0, 1, 1, 1], [0], [0]>} : vector<2x1x32xf32>, vector<2x128x32xf32>, vector<2x1x128xf32> -> vector<2x1x128xf32>
    "tpu.trace_stop"() : () -> ()
    %13 = tpu.iota {dimensions = array<i32: 2>} : vector<2x1x128xi32>
    %c8_i32 = arith.constant 8 : i32
    %14 = vector.broadcast %c8_i32 : i32 to vector<2x1x128xi32>
    %15 = arith.cmpi slt, %13, %14 : vector<2x1x128xi32>
    %cst_11 = arith.constant -1.000000e+30 : f32
    %16 = vector.broadcast %cst_11 : f32 to vector<2x1x128xf32>
    %17 = arith.select %15, %12, %16 : vector<2x1x128xi1>, vector<2x1x128xf32>
    %cst_12 = arith.constant dense<0xFF800000> : vector<2x1xf32>
    %18 = vector.multi_reduction <maximumf>, %17, %cst_12 [2] : vector<2x1x128xf32> to vector<2x1xf32>
    %19 = vector.shape_cast %18 : vector<2x1xf32> to vector<2x1x1xf32>
    %20 = vector.broadcast %19 : vector<2x1x1xf32> to vector<2x1x128xf32>
    %21 = arith.subf %17, %20 : vector<2x1x128xf32>
    %22 = math.exp %21 : vector<2x1x128xf32>
    %cst_13 = arith.constant dense<0.000000e+00> : vector<2x1xf32>
    %23 = vector.multi_reduction <add>, %22, %cst_13 [2] : vector<2x1x128xf32> to vector<2x1xf32>
    %24 = vector.shape_cast %23 : vector<2x1xf32> to vector<2x1x1xf32>
    %25 = tpu.reciprocal %24 : vector<2x1x1xf32> -> vector<2x1x1xf32>
    %26 = vector.broadcast %25 : vector<2x1x1xf32> to vector<2x1x128xf32>
    %27 = arith.mulf %22, %26 : vector<2x1x128xf32>
    %c0_14 = arith.constant 0 : index
    %c0_15 = arith.constant 0 : index
    %c0_16 = arith.constant 0 : index
    %28 = vector.load %arg5[%c0_14, %c0_15, %c0_16] : memref<2x1x128xf32, #tpu.memory_space<vmem>>, vector<2x1x128xf32>
    tpu.vector_store %arg5[%c0_14, %c0_15, %c0_16], %27 {strides = array<i32>} : memref<2x1x128xf32, #tpu.memory_space<vmem>>, vector<2x1x128xf32>,
    return
  }
  func.func @transform_0(%arg0: i32) -> (i32, i32, i32) {
    %c0_i32 = arith.constant 0 : i32
    %c0_i32_0 = arith.constant 0 : i32
    %c0_i32_1 = arith.constant 0 : i32
    return %arg0, %c0_i32, %c0_i32_0 : i32, i32, i32
  }
  func.func @transform_1(%arg0: i32) -> (i32, i32, i32) {
    %c0_i32 = arith.constant 0 : i32
    %c0_i32_0 = arith.constant 0 : i32
    %c0_i32_1 = arith.constant 0 : i32
    return %arg0, %c0_i32, %c0_i32_0 : i32, i32, i32
  }
  func.func @transform_2(%arg0: i32) -> (i32, i32) {
    %c0_i32 = arith.constant 0 : i32
    %c0_i32_0 = arith.constant 0 : i32
    %c0_i32_1 = arith.constant 0 : i32
    return %c0_i32, %c0_i32_0 : i32, i32
  }
  func.func @transform_3(%arg0: i32) -> (i32, i32, i32) {
    %c0_i32 = arith.constant 0 : i32
    %c0_i32_0 = arith.constant 0 : i32
    %c0_i32_1 = arith.constant 0 : i32
    %c0_i32_2 = arith.constant 0 : i32
    return %c0_i32, %c0_i32_0, %c0_i32_1 : i32, i32, i32
  }
  func.func @transform_4(%arg0: i32) -> (i32, i32, i32) {
    %c0_i32 = arith.constant 0 : i32
    %c0_i32_0 = arith.constant 0 : i32
    %c0_i32_1 = arith.constant 0 : i32
    return %arg0, %c0_i32, %c0_i32_0 : i32, i32, i32
  }
}

</mosaic_0001>

<bundles_post_ra>
// kernel: tpu_custom_call.1
= control target key start
LH: loop header
LB: loop body
LE: loop exit
PB: predicated region body
PF: predicated region fallthrough
CT: control target
= control target key end

     0   :  { %9 = vsyncpa [#allocation3], 0  ;;  %s1575_s0 = inlined_call_operand.hbm [shape: f32[2,128,16], index: 0, kind: input, shape index: {}]   ;;  %s1576_s1 = inlined_call_operand.hbm [shape: f32[2,1,32], index: 1, kind: input, shape index: {}]   ;;  %s1577_s2 = inlined_call_operand.hbm [shape: f32[16,32], index: 2, kind: input, shape index: {}]   ;;  %s1578_s3 = inlined_call_operand.hbm [shape: f32[1,1,32], index: 3, kind: input, shape index: {}]   ;;  %s1579_s4 = inlined_call_operand.hbm [shape: f32[2,1,128], index: 4, kind: output, shape index: {}]  }
   0x1   :  { %10 = vsyncpa [#allocation6], 0 }
   0x2   :  { %11 = vsyncpa [#allocation9], 0 }
   0x3   :  { %12 = vsyncpa [#allocation4], 0  ;;  %s1323_s15 = smov [#allocation5]   ;;  %s1205_s19 = scalar_lea.hbm %s1576_s1, 32 }
   0x4   :  { %s30_s16 = sshll.u32 %s1323_s15, 4  ;;  %p1206_p0 = scmp.ne.s32.totalorder %s1576_s1, %s1205_s19  ;;  %s31_s16 = int_to_ptr.vmem [resolvable:$true] %s30_s16 }
   0x5   :  { %p1209_p1 = scmp.lt.u32.totalorder %s1205_s19, %s1576_s1 }
   0x7   :  { %p1211_p2 = pnand %p1209_p1, %p1206_p0 }
   0x9   :  { %1214 = shalt.err (!%p1211_p2)
}
   0xa   :  { %s1215_s24 = scalar_lea.vmem %s31_s16, 32  ;;  %p1220_p4 = scmp.lt.s32.totalorder %s31_s16, %s31_s16 }
   0xb   :  { %p1216_p3 = scmp.ne.s32.totalorder %s31_s16, %s1215_s24  ;;  %p1221_p5 = scmp.lt.s32.totalorder %s1215_s24, %s1215_s24 }
   0xd   :  { %p1222_p6 = por %p1221_p5, %p1220_p4 }
   0xf   :  { %p1223_p7 = pnand %p1222_p6, %p1216_p3 }
  0x11   :  { %1226 = shalt.err (!%p1223_p7)
}
  0x12   :  { %s1324_s25 = smov 16   ;;  %s1325_s26 = smov 1  }
  0x13   :  { %36 = dma.hbm_to_vmem [thread:$0]  %s1576_s1, 32, %s31_s16, [#allocation6], %s1324_s25, %s1324_s25, %s1325_s26  }
  0x14   :  { %s1326_s29 = smov [#allocation2]   ;;  %s1227_s7 = scalar_lea.hbm %s1575_s0, 4096 }
  0x15   :  { %s18_s30 = sshll.u32 %s1326_s29, 4  ;;  %p1228_p8 = scmp.ne.s32.totalorder %s1575_s0, %s1227_s7  ;;  %s19_s30 = int_to_ptr.vmem [resolvable:$true] %s18_s30 }
  0x16   :  { %p1231_p9 = scmp.lt.u32.totalorder %s1227_s7, %s1575_s0 }
  0x18   :  { %p1233_p10 = pnand %p1231_p9, %p1228_p8 }
  0x1a   :  { %1236 = shalt.err (!%p1233_p10)
}
  0x1b   :  { %s1237_s12 = scalar_lea.vmem %s19_s30, 4096  ;;  %p1242_p12 = scmp.lt.s32.totalorder %s19_s30, %s19_s30 }
  0x1c   :  { %p1238_p11 = scmp.ne.s32.totalorder %s19_s30, %s1237_s12  ;;  %p1243_p13 = scmp.lt.s32.totalorder %s1237_s12, %s1237_s12 }
  0x1e   :  { %p1244_p0 = por %p1243_p13, %p1242_p12 }
  0x20   :  { %p1245_p1 = pnand %p1244_p0, %p1238_p11 }
  0x22   :  { %1248 = shalt.err (!%p1245_p1)
}
  0x23   :  { %s1327_s1 = smov 128   ;;  %s1328_s13 = smov 8  }
  0x24   :  { %24 = dma.hbm_to_vmem [thread:$0]  %s1575_s0, 4096, %s19_s30, [#allocation3], %s1327_s1, %s1327_s1, %s1328_s13  }
  0x25   :  { %s1329_s16 = smov [#allocation7]   ;;  %s1330_s18 = smov [#allocation8]  }
  0x26   :  { %s42_s17 = sshll.u32 %s1329_s16, 4  ;;  %s55_s19 = sshll.u32 %s1330_s18, 4  ;;  %s43_s17 = int_to_ptr.vmem [resolvable:$true] %s42_s17  ;;  %s56_s19 = int_to_ptr.vmem [resolvable:$true] %s55_s19 }
  0x27   :  { %s1249_s22 = scalar_lea.hbm %s1577_s2, 256 }
  0x28   :  { %p1250_p2 = scmp.ne.s32.totalorder %s1577_s2, %s1249_s22  ;;  %p1253_p3 = scmp.lt.u32.totalorder %s1249_s22, %s1577_s2 }
  0x2a   :  { %p1255_p4 = pnand %p1253_p3, %p1250_p2 }
  0x2c   :  { %1258 = shalt.err (!%p1255_p4)
}
  0x2d   :  { %s1259_s0 = scalar_lea.vmem %s43_s17, 256  ;;  %p1264_p6 = scmp.lt.s32.totalorder %s43_s17, %s43_s17 }
  0x2e   :  { %p1260_p5 = scmp.ne.s32.totalorder %s43_s17, %s1259_s0  ;;  %p1265_p7 = scmp.lt.s32.totalorder %s1259_s0, %s1259_s0 }
  0x30   :  { %p1266_p8 = por %p1265_p7, %p1264_p6 }
  0x32   :  { %p1267_p9 = pnand %p1266_p8, %p1260_p5 }
  0x34   :  { %1270 = shalt.err (!%p1267_p9)
}
  0x35   :  { %48 = dma.hbm_to_vmem [thread:$0]  %s1577_s2, 256, %s43_s17, [#allocation6], %s1327_s1, %s1327_s1, %s1328_s13  }
  0x36   :  { %s1271_s7 = scalar_lea.hbm %s1578_s3, 16 }
  0x37   :  { %p1272_p10 = scmp.ne.s32.totalorder %s1578_s3, %s1271_s7  ;;  %p1275_p11 = scmp.lt.u32.totalorder %s1271_s7, %s1578_s3 }
  0x39   :  { %p1277_p12 = pnand %p1275_p11, %p1272_p10 }
  0x3b   :  { %1280 = shalt.err (!%p1277_p12)
}
  0x3c   :  { %s1281_s12 = scalar_lea.vmem %s56_s19, 16  ;;  %s1285_s14 = scalar_lea.vmem %s56_s19, 32 }
  0x3d   :  { %p1282_p13 = scmp.ne.s32.totalorder %s56_s19, %s1281_s12  ;;  %p1286_p0 = scmp.lt.s32.totalorder %s56_s19, %s56_s19 }
  0x3e   :  { %p1287_p1 = scmp.lt.s32.totalorder %s1285_s14, %s1281_s12 }
  0x40   :  { %p1288_p2 = por %p1287_p1, %p1286_p0 }
  0x42   :  { %p1289_p3 = pnand %p1288_p2, %p1282_p13 }
  0x44   :  { %1292 = shalt.err (!%p1289_p3)
}
  0x45   :  { %58 = dma.hbm_to_vmem [thread:$0]  %s1578_s3, 16, %s56_s19, [#allocation9]  }
  0x46   :  { %1315 = dma.done.wait [#allocation3], 4096  }
  0x47   :  { %1316 = vsyncadd [#allocation3], 4294963200 }
  0x48   :  { %1317 = dma.done.wait [#allocation6], 288  }
  0x49   :  { %1318 = vsyncadd [#allocation6], 4294967008 }
  0x4a   :  { %1319 = dma.done.wait [#allocation9], 16  }
  0x4b   :  { %1320 = vsyncadd [#allocation9], 4294967280  ;;  %vm105_vm0 = vcmask 130048   ;;  %v103_v0 = vld [vmem:[#allocation7] sm:$0xff]  ;;  %v104_v1 = vld [vmem:[#allocation7 + $0x8] sm:$0xff]  ;;  %v1331_v35 = vmov 0.0|0.0  }
  0x4c   :  { %v71_v2 = vld [vmem:[#allocation2] sm:$0xff]  ;;  %v1053_v3 = vpack.c.bf16 %v104_v1, %v103_v0  ;;  %v72_v4 = vld [vmem:[#allocation2 + $0x8] sm:$0xff]  ;;  %v73_v5 = vld [vmem:[#allocation2 + $0x10] sm:$0xff]  ;;  %1057 = vmatprep.subr.bf16.mxu1 %v1331_v35  ;;  %vm1332_vm1 = vmmov 0   ;;  %v1333_v36 = vmov 0.0   ;;  %vm506_vm2 = vcmask 261120  }
  0x4d   :  { %935 = vmatprep.mubr.msk.f32.mxu0 %vm105_vm0, %v71_v2  ;;  %v74_v6 = vld [vmem:[#allocation2 + $0x18] sm:$0xff]  ;;  %v75_v7 = vld [vmem:[#allocation2 + $0x20] sm:$0xff]  ;;  %v76_v8 = vld [vmem:[#allocation2 + $0x28] sm:$0xff]  ;;  %1015 = vmatprep.mubr.msk.f32.mxu1 %vm1332_vm1, %v1333_v36  ;;  %vm751_vm5 = vcmask 1040384   ;;  %s1334_s3 = smov [#allocation10]  }
  0x4e   :  { %1054 = vmatprep.subr.bf16.mxu0 %v1053_v3  ;;  %v77_v9 = vld [vmem:[#allocation2 + $0x30] sm:$0xff]  ;;  %v78_v10 = vld [vmem:[#allocation2 + $0x38] sm:$0xff]  ;;  %v79_v11 = vld [vmem:[#allocation2 + $0x40] sm:$0xff]  ;;  %s781_s13 = sshll.u32 %s1334_s3, 4  ;;  %s782_s13 = int_to_ptr.vmem [resolvable:$true] %s781_s13 }
  0x4f   :  { %1056 = vmatpush3.bf16.msra.mxu0 %v1053_v3  ;;  %v80_v12 = vld [vmem:[#allocation2 + $0x48] sm:$0xff]  ;;  %v81_v13 = vld [vmem:[#allocation2 + $0x50] sm:$0xff]  ;;  %v82_v14 = vld [vmem:[#allocation2 + $0x58] sm:$0xff]  ;;  %s1293_s15 = scalar_lea.vmem %s782_s13, 32  ;;  %p1298_p5 = scmp.lt.s32.totalorder %s782_s13, %s782_s13 }
  0x50   :  { %v83_v15 = vld [vmem:[#allocation2 + $0x60] sm:$0xff]  ;;  %v84_v16 = vld [vmem:[#allocation2 + $0x68] sm:$0xff]  ;;  %v85_v17 = vld [vmem:[#allocation2 + $0x70] sm:$0xff]  ;;  %1089 = vmatprep.subr.bf16.mxu0 %v1331_v35  ;;  %p1294_p4 = scmp.ne.s32.totalorder %s782_s13, %s1293_s15  ;;  %p1299_p6 = scmp.lt.s32.totalorder %s1293_s15, %s1293_s15 }
  0x51   :  { %v86_v18 = vld [vmem:[#allocation2 + $0x78] sm:$0xff]  ;;  %v87_v19 = vld [vmem:[#allocation2 + $0x80] sm:$0xff]  ;;  %v88_v20 = vld [vmem:[#allocation2 + $0x88] sm:$0xff] }
  0x52   :  { %936 = vmatmul.mubr.msk.f32.vlgmr.msra.gmra.mrb[0].mxu0 %vm105_vm0, %v72_v4  ;;  %v89_v21 = vld [vmem:[#allocation2 + $0x90] sm:$0xff]  ;;  %v90_v22 = vld [vmem:[#allocation2 + $0x98] sm:$0xff]  ;;  %v91_v23 = vld [vmem:[#allocation2 + $0xa0] sm:$0xff]  ;;  %p1300_p7 = por %p1299_p6, %p1298_p5 }
  0x53   :  { %938 = vmatprep.mubr.msk.f32.mxu0 %vm105_vm0, %v73_v5  ;;  %v92_v24 = vld [vmem:[#allocation2 + $0xa8] sm:$0xff]  ;;  %v93_v25 = vld [vmem:[#allocation2 + $0xb0] sm:$0xff]  ;;  %v94_v26 = vld [vmem:[#allocation2 + $0xb8] sm:$0xff] }
  0x54   :  { %v95_v27 = vld [vmem:[#allocation2 + $0xc0] sm:$0xff]  ;;  %v96_v28 = vld [vmem:[#allocation2 + $0xc8] sm:$0xff]  ;;  %v97_v29 = vld [vmem:[#allocation2 + $0xd0] sm:$0xff]  ;;  %p1301_p8 = pnand %p1300_p7, %p1294_p4 }
  0x55   :  { %v98_v30 = vld [vmem:[#allocation2 + $0xd8] sm:$0xff]  ;;  %v99_v31 = vld [vmem:[#allocation2 + $0xe0] sm:$0xff]  ;;  %v100_v32 = vld [vmem:[#allocation2 + $0xe8] sm:$0xff] }
  0x56   :  { %939 = vmatmul.mubr.msk.f32.gmra.mrb[2].mxu0 %vm105_vm0, %v74_v6  ;;  %v101_v33 = vld [vmem:[#allocation2 + $0xf0] sm:$0xff]  ;;  %v102_v34 = vld [vmem:[#allocation2 + $0xf8] sm:$0xff]  ;;  %v1445_v37 = vld [vmem:[#allocation5] ss:$0 sm:$0xff] }
  0x57   :  { %941 = vmatprep.mubr.msk.f32.mxu0 %vm105_vm0, %v75_v7  ;;  %vm1457_vm3 = vmpackc.low %vm506_vm2, %vm506_vm2 }
  0x5a   :  { %942 = vmatmul.mubr.msk.f32.gmra.mrb[4].mxu0 %vm105_vm0, %v76_v8 }
  0x5b   :  { %944 = vmatprep.mubr.msk.f32.mxu0 %vm105_vm0, %v77_v9 }
  0x5e   :  { %945 = vmatmul.mubr.msk.f32.gmra.mrb[6].mxu0 %vm105_vm0, %v78_v10 }
  0x5f   :  { %947 = vmatprep.mubr.msk.f32.mxu0 %vm105_vm0, %v79_v11 }
  0x62   :  { %948 = vmatmul.mubr.msk.f32.gmra.mrb[8].mxu0 %vm105_vm0, %v80_v12 }
  0x63   :  { %950 = vmatprep.mubr.msk.f32.mxu0 %vm105_vm0, %v81_v13 }
  0x66   :  { %951 = vmatmul.mubr.msk.f32.gmra.mrb[10].mxu0 %vm105_vm0, %v82_v14 }
  0x67   :  { %953 = vmatprep.mubr.msk.f32.mxu0 %vm105_vm0, %v83_v15 }
  0x6a   :  { %954 = vmatmul.mubr.msk.f32.gmra.mrb[12].mxu0 %vm105_vm0, %v84_v16 }
  0x6b   :  { %956 = vmatprep.mubr.msk.f32.mxu0 %vm105_vm0, %v85_v17 }
  0x6e   :  { %957 = vmatmul.mubr.msk.f32.gmra.mrb[14].mxu0 %vm105_vm0, %v86_v18 }
  0x6f   :  { %959 = vmatprep.mubr.msk.f32.mxu0 %vm105_vm0, %v87_v19 }
  0x72   :  { %960 = vmatmul.mubr.msk.f32.gmra.mrb[16].mxu0 %vm105_vm0, %v88_v20 }
  0x73   :  { %962 = vmatprep.mubr.msk.f32.mxu0 %vm105_vm0, %v89_v21  ;;  %v1475_v21 = vld [vmem:[#allocation5 + $0x1] ss:$0 sm:$0xff] }
  0x76   :  { %963 = vmatmul.mubr.msk.f32.gmra.mrb[18].mxu0 %vm105_vm0, %v90_v22 }
  0x77   :  { %965 = vmatprep.mubr.msk.f32.mxu0 %vm105_vm0, %v91_v23 }
  0x7a   :  { %966 = vmatmul.mubr.msk.f32.gmra.mrb[20].mxu0 %vm105_vm0, %v92_v24 }
  0x7b   :  { %968 = vmatprep.mubr.msk.f32.mxu0 %vm105_vm0, %v93_v25 }
  0x7e   :  { %969 = vmatmul.mubr.msk.f32.gmra.mrb[22].mxu0 %vm105_vm0, %v94_v26 }
  0x7f   :  { %971 = vmatprep.mubr.msk.f32.mxu0 %vm105_vm0, %v95_v27 }
  0x82   :  { %972 = vmatmul.mubr.msk.f32.gmra.mrb[24].mxu0 %vm105_vm0, %v96_v28 }
  0x83   :  { %974 = vmatprep.mubr.msk.f32.mxu0 %vm105_vm0, %v97_v29 }
  0x86   :  { %975 = vmatmul.mubr.msk.f32.gmra.mrb[26].mxu0 %vm105_vm0, %v98_v30 }
  0x87   :  { %977 = vmatprep.mubr.msk.f32.mxu0 %vm105_vm0, %v99_v31 }
  0x8a   :  { %978 = vmatmul.mubr.msk.f32.gmra.mrb[28].mxu0 %vm105_vm0, %v100_v32 }
  0x8b   :  { %980 = vmatprep.mubr.msk.f32.mxu0 %vm105_vm0, %v101_v33 }
  0x8e   :  { %981 = vmatmul.mubr.msk.f32.gmra.mrb[30].mxu0 %vm105_vm0, %v102_v34 }
  0x8f   :  { %1050 = vmatprep.mubr.msk.f32.mxu0 %vm1332_vm1, %v1333_v36 }
 0x125   :  { %v937_v38 = vpop.f32.mrb[0].mxu0 }
 0x126   :  { %v442_v39 = vadd.f32 %v937_v38, %v1445_v37  ;;  %v268_v40 = vpop.f32.mrb[1].mxu0 }
 0x127   :  { %v441_v41 = vadd.f32 %v1445_v37, %v268_v40 }
 0x128   :  { %1133 = vtanh.f32 %v442_v39 }
 0x129   :  { %1135 = vtanh.f32 %v441_v41  ;;  %v940_v42 = vpop.f32.mrb[2].mxu0 }
 0x12a   :  { %v444_v43 = vadd.f32 %v940_v42, %v1445_v37  ;;  %v278_v44 = vpop.f32.mrb[3].mxu0 }
 0x12b   :  { %v443_v45 = vadd.f32 %v1445_v37, %v278_v44 }
 0x12c   :  { %1137 = vtanh.f32 %v444_v43 }
 0x12d   :  { %1139 = vtanh.f32 %v443_v45  ;;  %v943_v46 = vpop.f32.mrb[4].mxu0 }
 0x12e   :  { %v446_v47 = vadd.f32 %v943_v46, %v1445_v37  ;;  %v288_v48 = vpop.f32.mrb[5].mxu0 }
 0x12f   :  { %v445_v49 = vadd.f32 %v1445_v37, %v288_v48 }
 0x130   :  { %1141 = vtanh.f32 %v446_v47 }
 0x131   :  { %1143 = vtanh.f32 %v445_v49  ;;  %v946_v50 = vpop.f32.mrb[6].mxu0 }
 0x132   :  { %v1134_v51 = vpop.eup %1133  ;;  %v448_v52 = vadd.f32 %v946_v50, %v1445_v37  ;;  %v298_v53 = vpop.f32.mrb[7].mxu0 }
 0x133   :  { %v1136_v54 = vpop.eup %1135  ;;  %v447_v55 = vadd.f32 %v1445_v37, %v298_v53 }
 0x134   :  { %1145 = vtanh.f32 %v448_v52  ;;  %v1058_v57 = vpack.c.bf16 %v1134_v51, %v1136_v54 }
 0x135   :  { %1147 = vtanh.f32 %v447_v55  ;;  %v949_v58 = vpop.f32.mrb[8].mxu0 }
 0x136   :  { %v1138_v59 = vpop.eup %1137  ;;  %v450_v60 = vadd.f32 %v949_v58, %v1445_v37  ;;  %v308_v61 = vpop.f32.mrb[9].mxu0  ;;  %1060 = vmatpush3.bf16.xpose.msk.msra.mxu1 %vm1457_vm3, %v1058_v57 }
 0x137   :  { %v1140_v62 = vpop.eup %1139  ;;  %v449_v63 = vadd.f32 %v1445_v37, %v308_v61  ;;  %1061 = vmatprep.subr.bf16.mxu1 %v1331_v35 }
 0x138   :  { %1149 = vtanh.f32 %v450_v60  ;;  %v1062_v0 = vpack.c.bf16 %v1138_v59, %v1140_v62 }
 0x139   :  { %1151 = vtanh.f32 %v449_v63  ;;  %v952_v1 = vpop.f32.mrb[10].mxu0 }
 0x13a   :  { %v1142_v2 = vpop.eup %1141  ;;  %v452_v3 = vadd.f32 %v952_v1, %v1445_v37  ;;  %v318_v4 = vpop.f32.mrb[11].mxu0 }
 0x13b   :  { %v1144_v5 = vpop.eup %1143  ;;  %v451_v6 = vadd.f32 %v1445_v37, %v318_v4 }
 0x13c   :  { %1153 = vtanh.f32 %v452_v3  ;;  %v1066_v7 = vpack.c.bf16 %v1142_v2, %v1144_v5 }
 0x13d   :  { %1155 = vtanh.f32 %v451_v6  ;;  %v955_v8 = vpop.f32.mrb[12].mxu0 }
 0x13e   :  { %v1146_v9 = vpop.eup %1145  ;;  %v454_v10 = vadd.f32 %v955_v8, %v1445_v37  ;;  %v328_v11 = vpop.f32.mrb[13].mxu0  ;;  %1064 = vmatpush3.bf16.xpose.msk.msra.mxu1 %vm1457_vm3, %v1062_v0 }
 0x13f   :  { %v1148_v12 = vpop.eup %1147  ;;  %v453_v13 = vadd.f32 %v1445_v37, %v328_v11  ;;  %1065 = vmatprep.subr.bf16.mxu1 %v1331_v35 }
 0x140   :  { %1157 = vtanh.f32 %v454_v10  ;;  %v1070_v14 = vpack.c.bf16 %v1146_v9, %v1148_v12 }
 0x141   :  { %1159 = vtanh.f32 %v453_v13  ;;  %v958_v15 = vpop.f32.mrb[14].mxu0 }
 0x142   :  { %v1150_v16 = vpop.eup %1149  ;;  %v456_v17 = vadd.f32 %v958_v15, %v1445_v37  ;;  %v338_v18 = vpop.f32.mrb[15].mxu0 }
 0x143   :  { %v1152_v19 = vpop.eup %1151  ;;  %v455_v20 = vadd.f32 %v1445_v37, %v338_v18 }
 0x144   :  { %1161 = vtanh.f32 %v456_v17  ;;  %v1074_v22 = vpack.c.bf16 %v1150_v16, %v1152_v19 }
 0x145   :  { %1163 = vtanh.f32 %v455_v20  ;;  %v961_v23 = vpop.f32.mrb[16].mxu0 }
 0x146   :  { %v1477_v24 = vpop.eup %1153  ;;  %v458_v25 = vadd.f32 %v961_v23, %v1475_v21  ;;  %v348_v26 = vpop.f32.mrb[17].mxu0  ;;  %1068 = vmatpush3.bf16.xpose.msk.msra.mxu1 %vm1457_vm3, %v1066_v7 }
 0x147   :  { %v1156_v27 = vpop.eup %1155  ;;  %v457_v28 = vadd.f32 %v1475_v21, %v348_v26  ;;  %1069 = vmatprep.subr.bf16.mxu1 %v1331_v35  ;;  %v505_v26 = vld [vmem:[#allocation8] sm:$0x1] }
 0x148   :  { %1165 = vtanh.f32 %v458_v25  ;;  %v1078_v29 = vpack.c.bf16 %v1477_v24, %v1156_v27  ;;  %v746_v27 = vlaneseq }
 0x149   :  { %1167 = vtanh.f32 %v457_v28  ;;  %v964_v30 = vpop.f32.mrb[18].mxu0 }
 0x14a   :  { %v1485_v31 = vpop.eup %1157  ;;  %v460_v32 = vadd.f32 %v964_v30, %v1475_v21  ;;  %v358_v33 = vpop.f32.mrb[19].mxu0  ;;  %v747_v28 = vand.u32 127, %v746_v27 }
 0x14b   :  { %v1488_v34 = vpop.eup %1159  ;;  %v459_v36 = vadd.f32 %v1475_v21, %v358_v33 }
 0x14c   :  { %1169 = vtanh.f32 %v460_v32  ;;  %v1082_v37 = vpack.c.bf16 %v1485_v31, %v1488_v34  ;;  %vm748_vm4 = vcmp.lt.s32.totalorder %v747_v28, 8 }
 0x14d   :  { %1171 = vtanh.f32 %v459_v36  ;;  %v967_v38 = vpop.f32.mrb[20].mxu0 }
 0x14e   :  { %v1493_v39 = vpop.eup %1161  ;;  %1072 = vmatpush3.bf16.xpose.msk.msra.mxu1 %vm1457_vm3, %v1070_v14  ;;  %v462_v40 = vadd.f32 %v967_v38, %v1475_v21  ;;  %v368_v41 = vpop.f32.mrb[21].mxu0 }
 0x14f   :  { %v1498_v42 = vpop.eup %1163  ;;  %v461_v43 = vadd.f32 %v1475_v21, %v368_v41  ;;  %1073 = vmatprep.subr.bf16.mxu1 %v1331_v35 }
 0x150   :  { %1173 = vtanh.f32 %v462_v40  ;;  %v1086_v44 = vpack.c.bf16 %v1493_v39, %v1498_v42 }
 0x151   :  { %1175 = vtanh.f32 %v461_v43  ;;  %v970_v45 = vpop.f32.mrb[22].mxu0 }
 0x152   :  { %v1166_v46 = vpop.eup %1165  ;;  %v464_v47 = vadd.f32 %v970_v45, %v1475_v21  ;;  %v378_v48 = vpop.f32.mrb[23].mxu0 }
 0x153   :  { %v1168_v49 = vpop.eup %1167  ;;  %v463_v50 = vadd.f32 %v1475_v21, %v378_v48 }
 0x154   :  { %v1090_v51 = vpack.c.bf16 %v1166_v46, %v1168_v49  ;;  %1177 = vtanh.f32 %v464_v47 }
 0x155   :  { %1179 = vtanh.f32 %v463_v50  ;;  %v973_v52 = vpop.f32.mrb[24].mxu0 }
 0x156   :  { %v1170_v53 = vpop.eup %1169  ;;  %1076 = vmatpush3.bf16.xpose.msk.msra.mxu1 %vm1457_vm3, %v1074_v22  ;;  %1092 = vmatpush3.bf16.xpose.msk.msra.mxu0 %vm1457_vm3, %v1090_v51  ;;  %v466_v54 = vadd.f32 %v973_v52, %v1475_v21  ;;  %v388_v55 = vpop.f32.mrb[25].mxu0 }
 0x157   :  { %v1172_v57 = vpop.eup %1171  ;;  %1077 = vmatprep.subr.bf16.mxu1 %v1331_v35  ;;  %1093 = vmatprep.subr.bf16.mxu0 %v1331_v35  ;;  %v465_v58 = vadd.f32 %v1475_v21, %v388_v55 }
 0x158   :  { %v1094_v59 = vpack.c.bf16 %v1170_v53, %v1172_v57  ;;  %1181 = vtanh.f32 %v466_v54 }
 0x159   :  { %1183 = vtanh.f32 %v465_v58  ;;  %v976_v60 = vpop.f32.mrb[26].mxu0 }
 0x15a   :  { %v1174_v61 = vpop.eup %1173  ;;  %v468_v62 = vadd.f32 %v976_v60, %v1475_v21  ;;  %v398_v63 = vpop.f32.mrb[27].mxu0 }
 0x15b   :  { %v1176_v0 = vpop.eup %1175  ;;  %v467_v1 = vadd.f32 %v1475_v21, %v398_v63 }
 0x15c   :  { %v1098_v2 = vpack.c.bf16 %v1174_v61, %v1176_v0  ;;  %1185 = vtanh.f32 %v468_v62 }
 0x15d   :  { %1187 = vtanh.f32 %v467_v1  ;;  %v979_v3 = vpop.f32.mrb[28].mxu0 }
 0x15e   :  { %v1178_v4 = vpop.eup %1177  ;;  %1080 = vmatpush3.bf16.xpose.msk.msra.mxu1 %vm1457_vm3, %v1078_v29  ;;  %1096 = vmatpush3.bf16.xpose.msk.msra.mxu0 %vm1457_vm3, %v1094_v59  ;;  %v470_v5 = vadd.f32 %v979_v3, %v1475_v21  ;;  %v408_v6 = vpop.f32.mrb[29].mxu0 }
 0x15f   :  { %v1180_v7 = vpop.eup %1179  ;;  %1081 = vmatprep.subr.bf16.mxu1 %v1331_v35  ;;  %1097 = vmatprep.subr.bf16.mxu0 %v1331_v35  ;;  %v469_v8 = vadd.f32 %v1475_v21, %v408_v6 }
 0x160   :  { %v1102_v9 = vpack.c.bf16 %v1178_v4, %v1180_v7  ;;  %1189 = vtanh.f32 %v470_v5 }
 0x161   :  { %1191 = vtanh.f32 %v469_v8  ;;  %v982_v10 = vpop.f32.mrb[30].mxu0 }
 0x162   :  { %v1182_v11 = vpop.eup %1181  ;;  %v472_v12 = vadd.f32 %v982_v10, %v1475_v21  ;;  %v418_v13 = vpop.f32.mrb[31].mxu0 }
 0x163   :  { %v1184_v14 = vpop.eup %1183  ;;  %v471_v15 = vadd.f32 %v1475_v21, %v418_v13 }
 0x164   :  { %v1106_v16 = vpack.c.bf16 %v1182_v11, %v1184_v14  ;;  %1193 = vtanh.f32 %v472_v12 }
 0x165   :  { %1195 = vtanh.f32 %v471_v15 }
 0x166   :  { %v1186_v17 = vpop.eup %1185  ;;  %1084 = vmatpush3.bf16.xpose.msk.msra.mxu1 %vm1457_vm3, %v1082_v37  ;;  %1100 = vmatpush3.bf16.xpose.msk.msra.mxu0 %vm1457_vm3, %v1098_v2 }
 0x167   :  { %v1188_v18 = vpop.eup %1187  ;;  %1085 = vmatprep.subr.bf16.mxu1 %v1331_v35  ;;  %1101 = vmatprep.subr.bf16.mxu0 %v1331_v35 }
 0x168   :  { %v1110_v19 = vpack.c.bf16 %v1186_v17, %v1188_v18 }
 0x16a   :  { %v1190_v20 = vpop.eup %1189 }
 0x16b   :  { %v1192_v21 = vpop.eup %1191 }
 0x16c   :  { %v1114_v22 = vpack.c.bf16 %v1190_v20, %v1192_v21 }
 0x16e   :  { %v1194_v23 = vpop.eup %1193  ;;  %1088 = vmatpush3.bf16.xpose.msk.msra.mxu1 %vm1457_vm3, %v1086_v44  ;;  %1104 = vmatpush3.bf16.xpose.msk.msra.mxu0 %vm1457_vm3, %v1102_v9 }
 0x16f   :  { %v1196_v24 = vpop.eup %1195  ;;  %1105 = vmatprep.subr.bf16.mxu0 %v1331_v35 }
 0x170   :  { %v1118_v25 = vpack.c.bf16 %v1194_v23, %v1196_v24 }
 0x175   :  { %1016 = vmatmul.mubr.msk.f32.vlgmr.msra.gmra.mrb[0].mxu1 %vm506_vm2, %v505_v26 }
 0x176   :  { %1108 = vmatpush3.bf16.xpose.msk.msra.mxu0 %vm1457_vm3, %v1106_v16 }
 0x177   :  { %1109 = vmatprep.subr.bf16.mxu0 %v1331_v35 }
 0x17e   :  { %1112 = vmatpush3.bf16.xpose.msk.msra.mxu0 %vm1457_vm3, %v1110_v19 }
 0x17f   :  { %1113 = vmatprep.subr.bf16.mxu0 %v1331_v35 }
 0x186   :  { %1116 = vmatpush3.bf16.xpose.msk.msra.mxu0 %vm1457_vm3, %v1114_v22 }
 0x187   :  { %1117 = vmatprep.subr.bf16.mxu0 %v1331_v35 }
 0x18e   :  { %1120 = vmatpush3.bf16.xpose.msk.msra.mxu0 %vm1457_vm3, %v1118_v25 }
 0x195   :  { %1051 = vmatmul.mubr.msk.f32.vlgmr.msra.gmra.mrb[32].mxu0 %vm506_vm2, %v505_v26 }
 0x248   :  { %v624_v29 = vpop.f32.mrb[0].mxu1 }
 0x249   :  { %v749_v30 = vsel %vm748_vm4, %v624_v29, -1e+30  ;;  %v1017_v31 = vpop.f32.mrb[1].mxu1 }
 0x24a   :  { %v752_v32 = vsel %vm751_vm5, %v749_v30, -inf }
 0x24b   :  { %753 = vmax.xlane.f32.xlu0 %v752_v32 }
 0x268   :  { %v742_v33 = vpop.f32.mrb[32].mxu0 }
 0x269   :  { %v750_v34 = vsel %vm748_vm4, %v742_v33, -1e+30  ;;  %v1052_v36 = vpop.f32.mrb[33].mxu0 }
 0x26a   :  { %v755_v35 = vsel %vm751_vm5, %v750_v34, -inf }
 0x26b   :  { %756 = vmax.xlane.f32.xlu0 %v755_v35 }
 0x2d8   :  { %v754_v56 = vpop.xlane.xlu0 %753 }
 0x2d9   :  { %v758_v37 = vsub.f32 %v749_v30, %v754_v56 }
 0x2db   :  { %v760_v38 = vmul.f32 1.442695, %v758_v37 }
 0x2dd   :  { %1197 = vpow2.f32 %v760_v38 }
 0x2e7   :  { %v1198_v39 = vpop.eup %1197 }
 0x2e8   :  { %v764_v40 = vsel %vm751_vm5, %v1198_v39, 0.0 }
 0x2e9   :  { %765 = vadd.xlane.f32.xlu1 %v764_v40 }
 0x2f8   :  { %v757_v41 = vpop.xlane.xlu0 %756 }
 0x2f9   :  { %v759_v42 = vsub.f32 %v750_v34, %v757_v41 }
 0x2fb   :  { %v762_v43 = vmul.f32 1.442695, %v759_v42 }
 0x2fd   :  { %1199 = vpow2.f32 %v762_v43 }
 0x307   :  { %v1200_v44 = vpop.eup %1199 }
 0x308   :  { %v767_v45 = vsel %vm751_vm5, %v1200_v44, 0.0 }
 0x309   :  { %768 = vadd.xlane.f32.xlu1 %v767_v45 }
 0x376   :  { %v766_v46 = vpop.xlane.xlu1 %765 }
 0x377   :  { %1201 = vrcp.f32 %v766_v46 }
 0x381   :  { %v1202_v47 = vpop.eup %1201 }
 0x382   :  { %v772_v48 = vmul.f32 %v1202_v47, %v1198_v39 }
 0x384   :  { %774 = vst [vmem:[#allocation10] sm:$0x1] %v772_v48 }
 0x396   :  { %v769_v49 = vpop.xlane.xlu1 %768 }
 0x397   :  { %1203 = vrcp.f32 %v769_v49 }
 0x3a1   :  { %v1204_v50 = vpop.eup %1203 }
 0x3a2   :  { %v773_v51 = vmul.f32 %v1204_v50, %v1200_v44 }
 0x3a4   :  { %775 = vst [vmem:[#allocation10 + $0x1] sm:$0x1] %v773_v51 }
 0x3a5   :  { %1304 = shalt.err (!%p1301_p8)
}
 0x3a6   :  { %s1305_s18 = scalar_lea.hbm %s1579_s4, 32 }
 0x3a7   :  { %p1306_p9 = scmp.ne.s32.totalorder %s1579_s4, %s1305_s18  ;;  %p1309_p10 = scmp.lt.u32.totalorder %s1305_s18, %s1579_s4 }
 0x3a9   :  { %p1311_p11 = pnand %p1309_p10, %p1306_p9 }
 0x3ab   :  { %1314 = shalt.err (!%p1311_p11)
}
 0x3ac   :  { %787 = dma.vmem_to_hbm [thread:$0]  %s782_s13, 32, %s1579_s4, [#allocation4], %s1324_s25, %s1324_s25, %s1325_s26  }
 0x3ad   :  { %1321 = dma.done.wait [#allocation4], 32  }
 0x3ae   :  { %1322 = vsyncadd [#allocation4], 4294967264 }
 0x3af   :  { %791 = vsyncpa [#allocation3], 1 }
 0x3b0   :  { %792 = vsyncpa [#allocation6], 1 }
 0x3b1   :  { %793 = vsyncpa [#allocation9], 1 }
 0x3b2   :  { %794 = vsyncpa [#allocation4], 1 }

</bundles_post_ra>
